<compile_context>
chip_gen: v7x
topology: tpu7x:2x2x1
jax: 0.10.0
libtpu: 0.0.40
codegen_flags: <defaults>
</compile_context>

<pallas_src>
import jax
import jax.numpy as jnp
from jax.experimental import pallas as pl
from jax.experimental.pallas import tpu as pltpu


def _round_up(a, b):
    return ((a + b - 1) // b) * b


# ---------------------------------------------------------------------------
# Kernel
# ---------------------------------------------------------------------------
def complex_measurement_kernel(xr_ref, xi_ref, wt_ref, wb_ref, b_ref, o_ref):
    dout = o_ref.shape[-1]

    # Two MXU matmuls + one broadcast bias add produce the fused slab
    # [left_r | left_i | right_r | right_i]; every slice boundary is a
    # multiple of 128 lanes.
    y = (jnp.dot(xr_ref[...], wt_ref[...], preferred_element_type=jnp.float32)
         + jnp.dot(xi_ref[...], wb_ref[...], preferred_element_type=jnp.float32)
         + b_ref[...])

    left_r = y[:, 0 * dout:1 * dout]
    left_i = y[:, 1 * dout:2 * dout]
    right_r = y[:, 2 * dout:3 * dout]
    right_i = y[:, 3 * dout:4 * dout]

    # |left * right| == |left| * |right|  (factored magnitude)
    mag2 = ((left_r * left_r + left_i * left_i) *
            (right_r * right_r + right_i * right_i))
    o_ref[...] = jnp.sqrt(mag2).astype(o_ref.dtype)


# ---------------------------------------------------------------------------
# Host-side parameter packing
# ---------------------------------------------------------------------------
def pack_params(params, dout_pad):
    """Fuse the 4 weight matrices / 4 biases into W_top, W_bot, b_all.

    Each Dout-wide column block is zero-padded to `dout_pad` columns so all
    kernel slices and the output store are lane (128) aligned.
    """
    wtr, wti, wr, wi, btr, bti, br, bi = params

    def padc(a):
        pad = dout_pad - a.shape[1]
        return jnp.pad(a, ((0, 0), (0, pad))) if pad else a

    w_top = jnp.concatenate([padc(wtr), padc(wti), padc(wr), padc(wi)],
                            axis=1)                              # (D, 4*Dout_p)
    w_bot = jnp.concatenate([padc(-wti), padc(wtr), padc(-wi), padc(wr)],
                            axis=1)                              # (D, 4*Dout_p)
    b_all = jnp.concatenate([padc(btr - bti), padc(btr + bti),
                             padc(br - bi), padc(br + bi)], axis=1)
    return w_top, w_bot, b_all                                   # (1, 4*Dout_p)


# ---------------------------------------------------------------------------
# Wrapper
# ---------------------------------------------------------------------------
def complex_measurement(x_r, x_i, params, *, tile_max=1024,
                        vmem_tile_budget=20 << 20):
    """x_r, x_i: (N, emb_dim) float32. Returns (N, output_dim) float32."""
    N, D = x_r.shape
    dout = params[0].shape[1]
    dout_p = max(_round_up(dout, 128), 128)          # lane-aligned column block
    four = 4 * dout_p

    w_top, w_bot, b_all = pack_params(params, dout_p)

    # ---- per-tile VMEM footprint (bytes), used to gate tile_max -----------
    def vmem_need(t):
        x_bytes = 2 * (2 * t * D * 4)        # x_r + x_i, double-buffered
        o_bytes = 2 * (t * dout_p * 4)       # output, double-buffered
        y_bytes = t * four * 4               # fused intermediate
        w_bytes = 2 * (2 * D * four * 4)     # W_top + W_bot, double-buffered
        b_bytes = 2 * (four * 4)
        return x_bytes + o_bytes + y_bytes + w_bytes + b_bytes

    while tile_max > 8 and vmem_need(tile_max) > vmem_tile_budget:
        tile_max //= 2
    # (If weights alone blow the budget, W would need its own tiling — out of
    #  scope for these sizes.)

    # ---- tile selection: minimal padding waste, >=2 grid steps when N>=16 -
    n_tiles = max(pl.cdiv(N, tile_max), 2 if N >= 16 else 1)
    tile_n = _round_up(pl.cdiv(N, n_tiles), 8)
    n_pad = tile_n * n_tiles

    if n_pad != N:                           # at most a few rows of padding
        x_r = jnp.pad(x_r, ((0, n_pad - N), (0, 0)))
        x_i = jnp.pad(x_i, ((0, n_pad - N), (0, 0)))

    grid = (n_tiles,)

    x_spec = pl.BlockSpec((tile_n, D), lambda i: (i, 0))
    w_spec = pl.BlockSpec((D, four), lambda i: (0, 0))
    b_spec = pl.BlockSpec((1, four), lambda i: (0, 0))
    o_spec = pl.BlockSpec((tile_n, dout_p), lambda i: (i, 0))

    flops = 2 * 2 * n_pad * D * four + 7 * n_pad * dout_p
    bytes_accessed = 4 * (2 * n_pad * D + 2 * D * four + four + n_pad * dout_p)

    out = pl.pallas_call(
        complex_measurement_kernel,
        out_shape=jax.ShapeDtypeStruct((n_pad, dout_p), jnp.float32),
        grid_spec=pl.GridSpec(
            grid=grid,
            in_specs=[x_spec, x_spec, w_spec, w_spec, b_spec],
            out_specs=o_spec,
        ),
        compiler_params=pltpu.CompilerParams(
            dimension_semantics=("parallel",),
            vmem_limit_bytes=32 * 1024 * 1024,   # above v5e's 16 MiB default,
        ),                                       # well under v7x's 64 MiB phys
        cost_estimate=pl.CostEstimate(
            flops=flops, transcendentals=n_pad * dout_p,
            bytes_accessed=bytes_accessed),
    )(x_r, x_i, w_top, w_bot, b_all)

    return out[:N, :dout]


# ---------------------------------------------------------------------------
# Deterministic synthetic init + pure-JAX reference
# ---------------------------------------------------------------------------
def init_params(key, emb_dim, output_dim):
    """Mimics nn.Linear init (uniform in +/- 1/sqrt(in_features))."""
    ks = jax.random.split(key, 8)
    bound = 1.0 / jnp.sqrt(emb_dim)

    def w(k):  # stored pre-transposed: (emb_dim, output_dim)
        return jax.random.uniform(k, (emb_dim, output_dim), jnp.float32,
                                  -bound, bound)

    def b(k):
        return jax.random.uniform(k, (1, output_dim), jnp.float32,
                                  -bound, bound)

    # M_t.fc_r, M_t.fc_i, M.fc_r, M.fc_i  (weights then biases)
    return (w(ks[0]), w(ks[1]), w(ks[2]), w(ks[3]),
            b(ks[4]), b(ks[5]), b(ks[6]), b(ks[7]))


def reference(x_r, x_i, params):
    wtr, wti, wr, wi, btr, bti, br, bi = params

    def lin(x, w, b):
        return x @ w + b

    left_r = lin(x_r, wtr, btr) - lin(x_i, wti, bti)
    left_i = lin(x_i, wtr, btr) + lin(x_r, wti, bti)
    right_r = lin(x_r, wr, br) - lin(x_i, wi, bi)
    right_i = lin(x_i, wr, br) + lin(x_r, wi, bi)
    out_r = left_r * right_r - left_i * right_i
    out_i = left_i * right_r + left_r * right_i
    return jnp.sqrt(out_r ** 2 + out_i ** 2)


if __name__ == "__main__":
    batch, seq, emb_dim, output_dim = 2, 8, 32, 128

    key = jax.random.PRNGKey(0)
    k_xr, k_xi, k_p = jax.random.split(key, 3)

    x_r = jax.random.normal(k_xr, (batch, seq, emb_dim), jnp.float32)
    x_i = jax.random.normal(k_xi, (batch, seq, emb_dim), jnp.float32)
    params = init_params(k_p, emb_dim, output_dim)

    # flatten (batch, seq) -> N rows for the kernel
    xr2 = x_r.reshape(batch * seq, emb_dim)
    xi2 = x_i.reshape(batch * seq, emb_dim)

    out = complex_measurement(xr2, xi2, params)
    out = out.reshape(batch, seq, output_dim)
    jax.block_until_ready(out)

    ref = reference(xr2, xi2, params).reshape(batch, seq, output_dim)
    assert jnp.allclose(out, ref, atol=1e-4, rtol=1e-4), "mismatch vs reference"

    print("KERNEL_OK")
</pallas_src>

<mosaic_0001>
module attributes {stable_mosaic.version = 11 : i64} {
  func.func @complex_measurement_kernel(%arg0: i32, %arg1: memref<8x32xf32, #tpu.memory_space<vmem>>, %arg2: memref<8x32xf32, #tpu.memory_space<vmem>>, %arg3: memref<32x512xf32, #tpu.memory_space<vmem>>, %arg4: memref<32x512xf32, #tpu.memory_space<vmem>>, %arg5: memref<1x512xf32, #tpu.memory_space<vmem>>, %arg6: memref<8x128xf32, #tpu.memory_space<vmem>>) attributes {dimension_semantics = [#tpu.dimension_semantics<parallel>], iteration_bounds = array<i64: 2>, scalar_prefetch = 0 : i64, scratch_operands = 0 : i64, tpu.core_type = #tpu.core_type<tc>, window_params = [{transform_indices = @transform_0, window_bounds = array<i64: 8, 32>}, {transform_indices = @transform_1, window_bounds = array<i64: 8, 32>}, {pipeline_mode = #tpu.pipeline_mode<synchronous>, transform_indices = @transform_2, window_bounds = array<i64: 32, 512>}, {pipeline_mode = #tpu.pipeline_mode<synchronous>, transform_indices = @transform_3, window_bounds = array<i64: 32, 512>}, {pipeline_mode = #tpu.pipeline_mode<synchronous>, transform_indices = @transform_4, window_bounds = array<i64: 1, 512>}, {transform_indices = @transform_5, window_bounds = array<i64: 8, 128>}]} {
    %c0 = arith.constant 0 : index
    %c0_0 = arith.constant 0 : index
    %0 = vector.load %arg1[%c0, %c0_0] : memref<8x32xf32, #tpu.memory_space<vmem>>, vector<8x32xf32>
    %c0_1 = arith.constant 0 : index
    %c0_2 = arith.constant 0 : index
    %1 = vector.load %arg3[%c0_1, %c0_2] : memref<32x512xf32, #tpu.memory_space<vmem>>, vector<32x512xf32>
    %cst = arith.constant dense<0.000000e+00> : vector<8x512xf32>
    %2 = tpu.matmul %0, %1, %cst {dimension_numbers = #tpu.dot_dimension_numbers<[1], [0], [0], [1], [0, 0, 1, 1], [], []>} : vector<8x32xf32>, vector<32x512xf32>, vector<8x512xf32> -> vector<8x512xf32>
    %c0_3 = arith.constant 0 : index
    %c0_4 = arith.constant 0 : index
    %3 = vector.load %arg2[%c0_3, %c0_4] : memref<8x32xf32, #tpu.memory_space<vmem>>, vector<8x32xf32>
    %c0_5 = arith.constant 0 : index
    %c0_6 = arith.constant 0 : index
    %4 = vector.load %arg4[%c0_5, %c0_6] : memref<32x512xf32, #tpu.memory_space<vmem>>, vector<32x512xf32>
    %cst_7 = arith.constant dense<0.000000e+00> : vector<8x512xf32>
    %5 = tpu.matmul %3, %4, %cst_7 {dimension_numbers = #tpu.dot_dimension_numbers<[1], [0], [0], [1], [0, 0, 1, 1], [], []>} : vector<8x32xf32>, vector<32x512xf32>, vector<8x512xf32> -> vector<8x512xf32>
    %6 = arith.addf %2, %5 : vector<8x512xf32>
    %c0_8 = arith.constant 0 : index
    %c0_9 = arith.constant 0 : index
    %7 = vector.load %arg5[%c0_8, %c0_9] : memref<1x512xf32, #tpu.memory_space<vmem>>, vector<1x512xf32>
    %8 = vector.broadcast %7 : vector<1x512xf32> to vector<8x512xf32>
    %9 = arith.addf %6, %8 : vector<8x512xf32>
    %10 = vector.extract_strided_slice %9 {offsets = [0, 0], sizes = [8, 128], strides = [1, 1]} : vector<8x512xf32> to vector<8x128xf32>
    %11 = vector.extract_strided_slice %9 {offsets = [0, 128], sizes = [8, 128], strides = [1, 1]} : vector<8x512xf32> to vector<8x128xf32>
    %12 = vector.extract_strided_slice %9 {offsets = [0, 256], sizes = [8, 128], strides = [1, 1]} : vector<8x512xf32> to vector<8x128xf32>
    %13 = vector.extract_strided_slice %9 {offsets = [0, 384], sizes = [8, 128], strides = [1, 1]} : vector<8x512xf32> to vector<8x128xf32>
    %14 = arith.mulf %10, %10 : vector<8x128xf32>
    %15 = arith.mulf %11, %11 : vector<8x128xf32>
    %16 = arith.addf %14, %15 : vector<8x128xf32>
    %17 = arith.mulf %12, %12 : vector<8x128xf32>
    %18 = arith.mulf %13, %13 : vector<8x128xf32>
    %19 = arith.addf %17, %18 : vector<8x128xf32>
    %20 = arith.mulf %16, %19 : vector<8x128xf32>
    %21 = math.sqrt %20 : vector<8x128xf32>
    %c0_10 = arith.constant 0 : index
    %c0_11 = arith.constant 0 : index
    %22 = vector.load %arg6[%c0_10, %c0_11] : memref<8x128xf32, #tpu.memory_space<vmem>>, vector<8x128xf32>
    tpu.vector_store %arg6[%c0_10, %c0_11], %21 {strides = array<i32>} : memref<8x128xf32, #tpu.memory_space<vmem>>, vector<8x128xf32>,
    return
  }
  func.func @transform_0(%arg0: i32) -> (i32, i32) {
    %c0_i32 = arith.constant 0 : i32
    %c0_i32_0 = arith.constant 0 : i32
    return %arg0, %c0_i32 : i32, i32
  }
  func.func @transform_1(%arg0: i32) -> (i32, i32) {
    %c0_i32 = arith.constant 0 : i32
    %c0_i32_0 = arith.constant 0 : i32
    return %arg0, %c0_i32 : i32, i32
  }
  func.func @transform_2(%arg0: i32) -> (i32, i32) {
    %c0_i32 = arith.constant 0 : i32
    %c0_i32_0 = arith.constant 0 : i32
    %c0_i32_1 = arith.constant 0 : i32
    return %c0_i32, %c0_i32_0 : i32, i32
  }
  func.func @transform_3(%arg0: i32) -> (i32, i32) {
    %c0_i32 = arith.constant 0 : i32
    %c0_i32_0 = arith.constant 0 : i32
    %c0_i32_1 = arith.constant 0 : i32
    return %c0_i32, %c0_i32_0 : i32, i32
  }
  func.func @transform_4(%arg0: i32) -> (i32, i32) {
    %c0_i32 = arith.constant 0 : i32
    %c0_i32_0 = arith.constant 0 : i32
    %c0_i32_1 = arith.constant 0 : i32
    return %c0_i32, %c0_i32_0 : i32, i32
  }
  func.func @transform_5(%arg0: i32) -> (i32, i32) {
    %c0_i32 = arith.constant 0 : i32
    %c0_i32_0 = arith.constant 0 : i32
    return %arg0, %c0_i32 : i32, i32
  }
}

</mosaic_0001>

<bundles_post_ra>
// kernel: tpu_custom_call.1
= control target key start
LH: loop header
LB: loop body
LE: loop exit
PB: predicated region body
PF: predicated region fallthrough
CT: control target
= control target key end

     0   :  { %s1457_s0 = inlined_call_operand.hbm [shape: f32[16,32], index: 0, kind: input, shape index: {}]   ;;  %s1458_s1 = inlined_call_operand.hbm [shape: f32[16,32], index: 1, kind: input, shape index: {}]   ;;  %s1459_s2 = inlined_call_operand.hbm [shape: f32[32,512], index: 2, kind: input, shape index: {}]   ;;  %s1460_s3 = inlined_call_operand.hbm [shape: f32[32,512], index: 3, kind: input, shape index: {}]   ;;  %s1461_s4 = inlined_call_operand.vmem [shape: f32[1,512], index: 4, kind: input, shape index: {}]   ;;  %s1462_s5 = inlined_call_operand.hbm [shape: f32[16,128], index: 5, kind: output, shape index: {}]  }
   0x1   :  { %1467 = sst [smem:[#allocation16_spill]] %s1459_s2 }
   0x2   :  { %1468 = sst [smem:[#allocation17_spill]] %s1460_s3 }
   0x3   :  { %10 = vsyncpa [#allocation3], 0 }
   0x4   :  { %12 = vsyncpa [#allocation3 + $0x1], 0 }
   0x5   :  { %13 = vsyncpa [#allocation6], 0 }
   0x6   :  { %15 = vsyncpa [#allocation6 + $0x1], 0 }
   0x7   :  { %16 = vsyncpa [#allocation9], 0 }
   0x8   :  { %17 = vsyncpa [#allocation4], 0 }
   0x9   :  { %19 = vsyncpa [#allocation4 + $0x1], 0  ;;  %s1168_s18 = smov 0   ;;  %s1170_s19 = smov 0  }
   0xa   :  { %s1172_s20 = smov 0   ;;  %s1174_s21 = smov 0  }
   0xb LB: > { %s1189_s22 = sadd.s32 4294967295, %s1128_s21   ;;  %s798_s23 = sadd.s32 4294967294, %s1128_s21   ;;  %s1128_s21 = sphi %s1174_s21, %s1490_s21   ;;  %s1124_s20 = sphi %s1172_s20, %s1489_s20   ;;  %s1120_s19 = sphi %s1170_s19, %s1488_s19   ;;  %s1116_s18 = sphi %s1168_s18, %s1487_s18  }
   0xc   : > { %p45_p0 = scmp.ne.s32.totalorder %s1120_s19, %s1116_s18  ;;  %p1463_p1 = scmp.eq.s32.totalorder %s1189_s22, 0 }
   0xd   : > { %p164_p3 = scmp.eq.s32.totalorder %s798_s23, 1  ;;  %p799_p5 = scmp.ge.s32.totalorder %s1128_s21, 1 }
   0xe   : > { %p1198_p4 = por %p1463_p1, %p45_p0  ;;  %p171_p7 = scmp.lt.s32.totalorder %s1128_s21, 3 }
   0xf   : > { %p1203_p6 = por %p164_p3, %p45_p0  ;;  %s1130_s27 = smov [#allocation7]  }
  0x10   : > { %s1469_s24 = scalar_select %p1198_p4, 1, 0 }
  0x11   : > { %s1470_s25 = scalar_select %p1203_p6, 1, 0 }
  0x12   : > { %p1208_p8 = pnand %p799_p5, %p171_p7  ;;  %s183_s28 = sshll.u32 %s1130_s27, 4  ;;  %s1212_s28 = int_to_ptr.vmem [resolvable:$true] %s183_s28 }
  0x13   : > { %s1131_s30 = smov [#allocation8]   ;;  %s1473_s2 = sld [smem:[#allocation16_spill]] }
  0x14   : > { %s1471_s26 = scalar_select %p1208_p8, 1, 0 }
  0x15   : > { %p871_p9 = pneg %p1208_p8  ;;  %s196_s6 = sshll.u32 %s1131_s30, 4  ;;  %s1223_s6 = int_to_ptr.vmem [resolvable:$true] %s196_s6 }
  0x17   : > { %p1219_p11 = pnand %p871_p9, %p1463_p1 }
  0x19   : > { %s934_s9 = scalar_lea.hbm %s1473_s2, 2048  ;;  %p936_p13 = pneg %p1219_p11 }
  0x1a   : > { %p935_p12 = scmp.ne.s32.totalorder %s1473_s2, %s934_s9  ;;  %p941_p5 = scmp.lt.u32.totalorder %s934_s9, %s1473_s2 }
  0x1c   : > { %p937_p0 = pnand %p936_p13, %p935_p12 }
  0x1e   : > { %p938_p3 = pneg %p937_p0 }
  0x20   : > { %p943_p7 = pnand %p941_p5, %p938_p3 }
  0x22   : > { %946 = shalt.err (!%p943_p7)
}
  0x23   : > { %s947_s14 = scalar_lea.vmem %s1212_s28, 2048  ;;  %p955_p2 = scmp.lt.s32.totalorder %s1212_s28, %s1212_s28 }
  0x24   : > { %p948_p9 = scmp.ne.s32.totalorder %s1212_s28, %s947_s14  ;;  %p956_p12 = scmp.lt.s32.totalorder %s947_s14, %s947_s14 }
  0x26   : > { %p950_p10 = pnand %p948_p9, %p936_p13  ;;  %p957_p0 = por %p956_p12, %p955_p2 }
  0x28   : > { %p951_p1 = pneg %p950_p10 }
  0x2a   : > { %p958_p6 = pnand %p957_p0, %p951_p1 }
  0x2c   : > { %961 = shalt.err (!%p958_p6)
}
  0x2d   : > { %s1132_s15 = smov 512   ;;  %s1133_s16 = smov 32  }
  0x2e   : > { %874 = dma.hbm_to_vmem [thread:$0]  (!%p1219_p11), %s1473_s2, 2048, %s1212_s28, [#allocation6], %s1132_s15, %s1132_s15, %s1133_s16  }
  0x2f   : > { %s1474_s3 = sld [smem:[#allocation17_spill]] }
  0x35   : > { %s962_s7 = scalar_lea.hbm %s1474_s3, 2048 }
  0x36   : > { %p963_p2 = scmp.ne.s32.totalorder %s1474_s3, %s962_s7  ;;  %p969_p10 = scmp.lt.u32.totalorder %s962_s7, %s1474_s3 }
  0x38   : > { %p965_p1 = pnand %p963_p2, %p936_p13 }
  0x3a   : > { %p966_p6 = pneg %p965_p1 }
  0x3c   : > { %p971_p3 = pnand %p969_p10, %p966_p6 }
  0x3e   : > { %974 = shalt.err (!%p971_p3)
}
  0x3f   : > { %s975_s28 = scalar_lea.vmem %s1223_s6, 2048  ;;  %p983_p12 = scmp.lt.s32.totalorder %s1223_s6, %s1223_s6 }
  0x40   : > { %p976_p5 = scmp.ne.s32.totalorder %s1223_s6, %s975_s28  ;;  %p984_p0 = scmp.lt.s32.totalorder %s975_s28, %s975_s28 }
  0x42   : > { %p978_p7 = pnand %p976_p5, %p936_p13  ;;  %p985_p2 = por %p984_p0, %p983_p12 }
  0x44   : > { %p979_p9 = pneg %p978_p7 }
  0x46   : > { %p986_p1 = pnand %p985_p2, %p979_p9 }
  0x48   : > { %989 = shalt.err (!%p986_p1)
}
  0x49   : > { %877 = dma.hbm_to_vmem [thread:$0]  (!%p1219_p11), %s1474_s3, 2048, %s1223_s6, [#allocation9], %s1132_s15, %s1132_s15, %s1133_s16  }
  0x4a   : > { %s1278_s14 = sadd.s32 1, %s1128_s21   ;;  %s32_s29 = sadd.s32 1, %s1124_s20 }
  0x4b   : > { %s29_s17 = ssub.s32 %s1128_s21, %s1278_s14  ;;  %p39_p13 = scmp.ne.s32.totalorder %s1124_s20, %s1120_s19 }
  0x4c   : > { %p30_p6 = scmp.eq.s32.totalorder %s29_s17, 0  ;;  %p40_p10 = scmp.eq.s32.totalorder %s1128_s21, 0 }
  0x4d   : > { %p1475_p3 = scmp.eq.s32.totalorder %s1189_s22, 1  ;;  %p891_p7 = scmp.lt.s32.totalorder %s1128_s21, 2 }
  0x4e   : > { %s1294_s27 = scalar_select %p30_p6, %s1124_s20, %s32_s29  }
  0x4f   : > { %p1288_p5 = por %p1475_p3, %p39_p13  ;;  %p41_p9 = por %p40_p10, %p39_p13 }
  0x50   : > { %s213_s30 = sand.u32 1, %s1124_s20   ;;  %s804_s15 = sshll.u32 %s1128_s21, 7 }
  0x51   : > { %s1476_s23 = scalar_select %p1288_p5, 1, 0 }
  0x52   : > { %s1297_s6 = sshll.u32 %s213_s30, 3  ;;  %s1303_s8 = scalar_lea.hbm %s1457_s0, %s804_s15 }
  0x53   : > { %s217_s9 = scalar_lea.vmem [#allocation2], %s1297_s6  ;;  %p1308_p11 = pnand %p891_p7, %p41_p9 }
  0x54   : > { %s224_s10 = sshll.u32 %s217_s9, 4  ;;  %s1315_s13 = scalar_lea.hbm %s1458_s1, %s804_s15  ;;  %s1306_s10 = int_to_ptr.vmem [resolvable:$true] %s224_s10 }
  0x55   : > { %s231_s29 = sand.u32 1, %s1128_s21   ;;  %s214_s17 = scalar_lea.sflag [#allocation3], %s213_s30 }
  0x56   : > { %s990_s16 = scalar_lea.hbm %s1303_s8, 128  ;;  %p992_p0 = pneg %p1308_p11 }
  0x57   : > { %p991_p12 = scmp.ne.s32.totalorder %s1303_s8, %s990_s16  ;;  %s995_s2 = scalar_lea.hbm %s1457_s0, 256 }
  0x58   : > { %p996_p13 = scmp.lt.u32.totalorder %s1303_s8, %s1457_s0  ;;  %p997_p6 = scmp.lt.u32.totalorder %s995_s2, %s990_s16 }
  0x59   : > { %p993_p2 = pnand %p992_p0, %p991_p12  ;;  %p999_p3 = scmp.lt.u32.totalorder %s990_s16, %s1303_s8 }
  0x5a   : > { %p998_p10 = por %p997_p6, %p996_p13 }
  0x5b   : > { %p994_p1 = pneg %p993_p2 }
  0x5c   : > { %p1000_p7 = por %p999_p3, %p998_p10 }
  0x5e   : > { %p1001_p9 = pnand %p1000_p7, %p994_p1 }
  0x60   : > { %1004 = shalt.err (!%p1001_p9)
}
  0x61   : > { %s1005_s30 = scalar_lea.vmem %s1306_s10, 128  ;;  %s1134_s15 = smov [#allocation2]  }
  0x62   : > { %p1006_p12 = scmp.ne.s32.totalorder %s1306_s10, %s1005_s30  ;;  %s1010_s12 = sshll.u32 %s1134_s15, 4  ;;  %s1011_s12 = int_to_ptr.vmem [resolvable:$false] %s1010_s12 }
  0x63   : > { %s1012_s3 = scalar_lea.vmem %s1011_s12, 256  ;;  %p1013_p4 = scmp.lt.s32.totalorder %s1306_s10, %s1011_s12 }
  0x64   : > { %p1008_p2 = pnand %p1006_p12, %p992_p0  ;;  %p1014_p13 = scmp.lt.s32.totalorder %s1012_s3, %s1005_s30 }
  0x66   : > { %p1009_p5 = pneg %p1008_p2  ;;  %p1015_p6 = por %p1014_p13, %p1013_p4 }
  0x68   : > { %p1016_p10 = pnand %p1015_p6, %p1009_p5 }
  0x6a   : > { %1019 = shalt.err (!%p1016_p10)
}
  0x6b   : > { %881 = dma.hbm_to_vmem [thread:$0]  (!%p1308_p11), %s1303_s8, 128, %s1306_s10, %s214_s17  }
  0x6c   : > { %s235_s2 = scalar_lea.vmem [#allocation5], %s1297_s6  ;;  %s232_s7 = scalar_lea.sflag [#allocation6], %s231_s29 }
  0x6d   : > { %s242_s16 = sshll.u32 %s235_s2, 4  ;;  %s1020_s9 = scalar_lea.hbm %s1315_s13, 128  ;;  %s243_s16 = int_to_ptr.vmem [resolvable:$true] %s242_s16 }
  0x6e   : > { %p1021_p4 = scmp.ne.s32.totalorder %s1315_s13, %s1020_s9  ;;  %s1025_s15 = scalar_lea.hbm %s1458_s1, 256 }
  0x6f   : > { %p1026_p3 = scmp.lt.u32.totalorder %s1315_s13, %s1458_s1  ;;  %p1027_p7 = scmp.lt.u32.totalorder %s1025_s15, %s1020_s9 }
  0x70   : > { %p1023_p5 = pnand %p1021_p4, %p992_p0  ;;  %p1029_p12 = scmp.lt.u32.totalorder %s1020_s9, %s1315_s13 }
  0x71   : > { %p1028_p9 = por %p1027_p7, %p1026_p3 }
  0x72   : > { %p1024_p1 = pneg %p1023_p5 }
  0x73   : > { %p1030_p2 = por %p1029_p12, %p1028_p9 }
  0x75   : > { %p1031_p13 = pnand %p1030_p2, %p1024_p1 }
  0x77   : > { %1034 = shalt.err (!%p1031_p13)
}
  0x78   : > { %s1035_s6 = scalar_lea.vmem %s243_s16, 128  ;;  %s1135_s8 = smov [#allocation5]  }
  0x79   : > { %p1036_p6 = scmp.ne.s32.totalorder %s243_s16, %s1035_s6  ;;  %s1040_s10 = sshll.u32 %s1135_s8, 4  ;;  %s1041_s10 = int_to_ptr.vmem [resolvable:$false] %s1040_s10 }
  0x7a   : > { %s1042_s29 = scalar_lea.vmem %s1041_s10, 256  ;;  %p1043_p5 = scmp.lt.s32.totalorder %s243_s16, %s1041_s10 }
  0x7b   : > { %p1038_p10 = pnand %p1036_p6, %p992_p0  ;;  %p1044_p8 = scmp.lt.s32.totalorder %s1042_s29, %s1035_s6 }
  0x7d   : > { %p1039_p4 = pneg %p1038_p10  ;;  %p1045_p3 = por %p1044_p8, %p1043_p5 }
  0x7f   : > { %p1046_p7 = pnand %p1045_p3, %p1039_p4 }
  0x81   : > { %1049 = shalt.err (!%p1046_p7)
}
  0x82   : > { %884 = dma.hbm_to_vmem [thread:$0]  (!%p1308_p11), %s1315_s13, 128, %s243_s16, %s232_s7  }
  0x83   : > { %p1478_p1 = scmp.ne.s32.totalorder %s1471_s26, 0 }
  0x84   : > { %s1368_s17 = sand.u32 (!%p1478_p1), 1, %s1120_s19   ;;  %p1479_p8 = scmp.ne.s32.totalorder (!%p1478_p1), %s1469_s24, 0 }
  0x85   : > { %251 = sbr.rel (%p1478_p1) target bundleno = 422 (0x1a6), region = 40  ;;  %s1371_s2 = sshll.u32 (!%p1478_p1), %s1368_s17, 3 }
  0x86   : > { %s254_s9 = scalar_lea.sflag (!%p1478_p1), [#allocation3], %s1368_s17  ;;  %s257_s28 = scalar_lea.vmem (!%p1478_p1), [#allocation2], %s1371_s2 }
  0x8c   : > { %1095 = dma.done.wait (%p1479_p8), %s254_s9, 128  }
  0x8d   : > { %1097 = vsyncadd (%p1479_p8), %s254_s9, 4294967168  ;;  %s262_s26 = sand.u32 1, %s1189_s22   ;;  %s266_s13 = scalar_lea.vmem [#allocation5], %s1371_s2 }
  0x8e   : > { %s263_s11 = scalar_lea.sflag [#allocation6], %s262_s26 }
  0x8f   : > { %1099 = dma.done.wait (%p1479_p8), %s263_s11, 128  }
  0x90   : > { %1101 = vsyncadd (%p1479_p8), %s263_s11, 4294967168  ;;  %p1480_p11 = scmp.eq.s32.totalorder %s1189_s22, 0 }
  0x92   : > { %1103 = dma.done.wait (%p1480_p11), [#allocation6], 2048   ;;  %p1481_p0 = pmov %p1480_p11 }
  0x94   : > { %1105 = vsyncadd (%p1481_p0), [#allocation6], 4294965248  ;;  %p1482_p9 = pmov %p1481_p0 }
  0x95   : > { %p1483_p12 = pmov %p1481_p0 }
  0x96   : > { %1107 = dma.done.wait (%p1482_p9), [#allocation9], 2048  }
  0x97   : > { %1109 = vsyncadd (%p1483_p12), [#allocation9], 4294965248  ;;  %v1136_v0 = vmov 0.0   ;;  %v325_v1 = vld [vmem:[#allocation8 + $0x8] sm:$0xff]  ;;  %v327_v3 = vld [vmem:[#allocation8 + $0x18] sm:$0xff]  ;;  %vm340_vm0 = vcmask 261120   ;;  %v633_v51 = vlaneseq }
  0x98   : > { %408 = vmatprep.mubr.f32.mxu0 %v1136_v0  ;;  %479 = vmatprep.mubr.f32.mxu1 %v1136_v0  ;;  %v329_v2 = vld [vmem:[#allocation8 + $0x28] sm:$0xff]  ;;  %v331_v5 = vld [vmem:[#allocation8 + $0x38] sm:$0xff]  ;;  %v324_v6 = vld [vmem:[#allocation8] sm:$0xff]  ;;  %s818_s7 = sshll.u32 %s1189_s22, 7  ;;  %s305_s30 = scalar_lea.vmem [#allocation10], %s1371_s2 }
  0x99   : > { %v821_v4 = vpack.c.bf16 %v329_v2, %v325_v1  ;;  %v328_v7 = vld [vmem:[#allocation8 + $0x20] sm:$0xff]  ;;  %v829_v8 = vpack.c.bf16 %v331_v5, %v327_v3  ;;  %v326_v10 = vld [vmem:[#allocation8 + $0x10] sm:$0xff]  ;;  %v333_v12 = vld [vmem:[#allocation8 + $0x48] sm:$0xff]  ;;  %v634_v52 = vshrl.u32 %v633_v51, 7  ;;  %s686_s15 = sshll.u32 %s305_s30, 4  ;;  %s1413_s6 = scalar_lea.hbm %s1462_s5, %s818_s7  ;;  %s1415_s15 = int_to_ptr.vmem [resolvable:$true] %s686_s15 }
  0x9a   : > { %v823_v9 = vpack.c.bf16 %v328_v7, %v324_v6  ;;  %v330_v11 = vld [vmem:[#allocation8 + $0x30] sm:$0xff]  ;;  %v337_v14 = vld [vmem:[#allocation8 + $0x68] sm:$0xff]  ;;  %v335_v15 = vld [vmem:[#allocation8 + $0x58] sm:$0xff]  ;;  %s673_s22 = scalar_lea.sflag [#allocation4], %s1368_s17  ;;  %s1050_s8 = scalar_lea.vmem %s1415_s15, 128 }
  0x9b   : > { %822 = vmatprep.subr.bf16.mxu0 %v821_v4  ;;  %v831_v13 = vpack.c.bf16 %v330_v11, %v326_v10  ;;  %v339_v16 = vld [vmem:[#allocation8 + $0x78] sm:$0xff]  ;;  %830 = vmatprep.subr.bf16.mxu1 %v829_v8  ;;  %v825_v17 = vpack.c.bf16 %v337_v14, %v333_v12  ;;  %v332_v19 = vld [vmem:[#allocation8 + $0x40] sm:$0xff]  ;;  %v334_v21 = vld [vmem:[#allocation8 + $0x50] sm:$0xff]  ;;  %v635_v53 = vsub.s32 0, %v634_v52  ;;  %v643_v55 = vsub.s32 2, %v634_v52  ;;  %p1051_p2 = scmp.ne.s32.totalorder %s1415_s15, %s1050_s8  ;;  %p1484_p13 = scmp.ne.s32.totalorder %s1476_s23, 0 }
  0x9c   : > { %824 = vmatpush1.bf16.msra.mxu0 %v823_v9  ;;  %v833_v18 = vpack.c.bf16 %v339_v16, %v335_v15  ;;  %v336_v20 = vld [vmem:[#allocation8 + $0x60] sm:$0xff]  ;;  %v338_v23 = vld [vmem:[#allocation8 + $0x70] sm:$0xff]  ;;  %v308_v24 = vld [vmem:[#allocation7 + $0x8] sm:$0xff]  ;;  %v639_v56 = vsub.s32 1, %v634_v52  ;;  %v647_v57 = vsub.s32 3, %v634_v52  ;;  %s1137_s10 = smov [#allocation10]  }
  0x9d   : > { %832 = vmatpush1.bf16.msra.mxu1 %v831_v13  ;;  %v827_v22 = vpack.c.bf16 %v336_v20, %v332_v19  ;;  %826 = vmatprep.subr.bf16.mxu0 %v825_v17  ;;  %v835_v25 = vpack.c.bf16 %v338_v23, %v334_v21  ;;  %v323_v26 = vld [vmem:[%s266_s13] sm:$0xff]  ;;  %v312_v27 = vld [vmem:[#allocation7 + $0x28] sm:$0xff]  ;;  %v307_v32 = vld [vmem:[#allocation7] sm:$0xff]  ;;  %p1052_p6 = pnand %p1051_p2, %p1484_p13  ;;  %s1054_s29 = sshll.u32 %s1137_s10, 4  ;;  %s1055_s29 = int_to_ptr.vmem [resolvable:$false] %s1054_s29 }
  0x9e   : > { %834 = vmatprep.subr.bf16.mxu1 %v833_v18  ;;  %v310_v28 = vld [vmem:[#allocation7 + $0x18] sm:$0xff]  ;;  %v837_v30 = vpack.c.bf16 %v312_v27, %v308_v24  ;;  %v311_v33 = vld [vmem:[#allocation7 + $0x20] sm:$0xff]  ;;  %v309_v34 = vld [vmem:[#allocation7 + $0x10] sm:$0xff]  ;;  %s1056_s2 = scalar_lea.vmem %s1055_s29, 256  ;;  %p1057_p4 = scmp.lt.s32.totalorder %s1415_s15, %s1055_s29 }
  0x9f   : > { %v314_v29 = vld [vmem:[#allocation7 + $0x38] sm:$0xff]  ;;  %v839_v35 = vpack.c.bf16 %v311_v33, %v307_v32  ;;  %v313_v36 = vld [vmem:[#allocation7 + $0x30] sm:$0xff]  ;;  %v316_v37 = vld [vmem:[#allocation7 + $0x48] sm:$0xff]  ;;  %p1053_p10 = pneg %p1052_p6  ;;  %p1058_p5 = scmp.lt.s32.totalorder %s1056_s2, %s1050_s8 }
  0xa0   : > { %v845_v31 = vpack.c.bf16 %v314_v29, %v310_v28  ;;  %828 = vmatpush1.bf16.msra.mxu0 %v827_v22  ;;  %v320_v38 = vld [vmem:[#allocation7 + $0x68] sm:$0xff]  ;;  %v847_v39 = vpack.c.bf16 %v313_v36, %v309_v34  ;;  %v318_v41 = vld [vmem:[#allocation7 + $0x58] sm:$0xff]  ;;  %v315_v43 = vld [vmem:[#allocation7 + $0x40] sm:$0xff] }
  0xa1   : > { %836 = vmatpush1.bf16.msra.mxu1 %v835_v25  ;;  %838 = vmatprep.subr.bf16.mxu0 %v837_v30  ;;  %v841_v40 = vpack.c.bf16 %v320_v38, %v316_v37  ;;  %v322_v42 = vld [vmem:[#allocation7 + $0x78] sm:$0xff]  ;;  %v319_v45 = vld [vmem:[#allocation7 + $0x60] sm:$0xff]  ;;  %v317_v46 = vld [vmem:[#allocation7 + $0x50] sm:$0xff]  ;;  %p1059_p3 = por %p1058_p5, %p1057_p4 }
  0xa2   : > { %846 = vmatprep.subr.bf16.mxu1 %v845_v31  ;;  %v849_v44 = vpack.c.bf16 %v322_v42, %v318_v41  ;;  %v321_v47 = vld [vmem:[#allocation7 + $0x70] sm:$0xff]  ;;  %v843_v48 = vpack.c.bf16 %v319_v45, %v315_v43  ;;  %v306_v50 = vld [vmem:[%s257_s28] sm:$0xff] }
  0xa3   : > { %813 = vmatmul.mubr.msk.f32.vlgmr.msra.gmra.mrb[0].mxu0 %vm340_vm0, %v323_v26  ;;  %v851_v49 = vpack.c.bf16 %v321_v47, %v317_v46  ;;  %v631_v54 = vld [vmem:[%s1461_s4] sm:$0xf]  ;;  %p1060_p7 = pnand %p1059_p3, %p1053_p10 }
  0xa4   : > { %814 = vmatmul.mubr.msk.f32.vlgmr.msra.gmra.mrb[0].mxu1 %vm340_vm0, %v323_v26  ;;  %840 = vmatpush1.bf16.msra.mxu0 %v839_v35  ;;  %v636_v58 = vrot.slane %v631_v54, %v635_v53  ;;  %v644_v59 = vrot.slane %v631_v54, %v643_v55  ;;  %v640_v60 = vrot.slane %v631_v54, %v639_v56 }
  0xa5   : > { %848 = vmatpush1.bf16.msra.mxu1 %v847_v39  ;;  %842 = vmatprep.subr.bf16.mxu0 %v841_v40  ;;  %v648_v61 = vrot.slane %v631_v54, %v647_v57 }
  0xa6   : > { %850 = vmatprep.subr.bf16.mxu1 %v849_v44  ;;  %553 = vmatprep.mubr.f32.mxu0 %v1136_v0 }
  0xa7   : > { %624 = vmatprep.mubr.f32.mxu1 %v1136_v0 }
  0xa8   : > { %844 = vmatpush1.bf16.msra.mxu0 %v843_v48 }
  0xa9   : > { %852 = vmatpush1.bf16.msra.mxu1 %v851_v49 }
  0xab   : > { %815 = vmatmul.mubr.msk.f32.vlgmr.msra.gmra.mrb[0].mxu0 %vm340_vm0, %v306_v50 }
  0xac   : > { %816 = vmatmul.mubr.msk.f32.vlgmr.msra.gmra.mrb[0].mxu1 %vm340_vm0, %v306_v50 }
 0x17e   : > { %v555_v62 = vpop.f32.mrb[0].mxu0 }
 0x17f   : > { %v653_v63 = vadd.f32 %v636_v58, %v555_v62  ;;  %v626_v0 = vpop.f32.mrb[0].mxu1  ;;  %v557_v1 = vpop.f32.mrb[1].mxu0 }
 0x180   : > { %v655_v2 = vadd.f32 %v644_v59, %v626_v0  ;;  %v654_v3 = vadd.f32 %v640_v60, %v557_v1  ;;  %v628_v4 = vpop.f32.mrb[1].mxu1 }
 0x181   : > { %v657_v5 = vmul.f32 %v653_v63, %v653_v63  ;;  %v656_v6 = vadd.f32 %v648_v61, %v628_v4 }
 0x182   : > { %v660_v7 = vmul.f32 %v655_v2, %v655_v2  ;;  %v658_v8 = vmul.f32 %v654_v3, %v654_v3 }
 0x183   : > { %v661_v9 = vmul.f32 %v656_v6, %v656_v6 }
 0x184   : > { %v659_v10 = vadd.f32 %v658_v8, %v657_v5 }
 0x185   : > { %v662_v11 = vadd.f32 %v661_v9, %v660_v7 }
 0x187   : > { %v663_v12 = vmul.f32 %v662_v11, %v659_v10 }
 0x189   : > { %932 = vrsqrt.f32 %v663_v12  ;;  %vm666_vm1 = vcmp.eq.f32.partialorder %v663_v12, inf  ;;  %v669_v15 = vand.u32 2147483648, %v663_v12  ;;  %vm668_vm2 = vcmp.eq.f32.partialorder %v663_v12, 0.0 }
 0x193   : > { %v933_v13 = vpop.eup %932 }
 0x194   : > { %v665_v14 = vmul.f32 %v933_v13, %v663_v12 }
 0x196   : > { %v667_v16 = vsel %vm666_vm1, %v663_v12, %v665_v14 }
 0x197   : > { %v670_v17 = vsel %vm668_vm2, %v669_v15, %v667_v16 }
 0x198   : > { %671 = vst [vmem:[%s305_s30] sm:$0xff] %v670_v17 }
 0x199   : > { %1063 = shalt.err (!%p1060_p7)
}
 0x19a   : > { %s1064_s17 = scalar_lea.hbm %s1413_s6, 128  ;;  %s1068_s26 = scalar_lea.hbm %s1462_s5, 256 }
 0x19b   : > { %p1065_p1 = scmp.ne.s32.totalorder %s1413_s6, %s1064_s17  ;;  %p1069_p0 = scmp.lt.u32.totalorder %s1413_s6, %s1462_s5 }
 0x19c   : > { %p1070_p9 = scmp.lt.u32.totalorder %s1068_s26, %s1064_s17  ;;  %p1072_p2 = scmp.lt.u32.totalorder %s1064_s17, %s1413_s6 }
 0x19d   : > { %p1066_p8 = pnand %p1065_p1, %p1484_p13 }
 0x19e   : > { %p1071_p12 = por %p1070_p9, %p1069_p0 }
 0x19f   : > { %p1067_p11 = pneg %p1066_p8 }
 0x1a0   : > { %p1073_p6 = por %p1072_p2, %p1071_p12 }
 0x1a2   : > { %p1074_p10 = pnand %p1073_p6, %p1067_p11 }
 0x1a4   : > { %1077 = shalt.err (!%p1074_p10)
}
 0x1a5   : > { %869 = dma.vmem_to_hbm [thread:$0]  (%p1484_p13), %s1415_s15, 128, %s1413_s6, %s673_s22  }
 0x1a6 PF: > { %s698_s24 = sand.u32 1, %s1116_s18   ;;  %p1485_p4 = scmp.ne.s32.totalorder %s1470_s25, 0 }
 0x1a7   : > { %p1486_p5 = scmp.ge.s32.totalorder %s1128_s21, 2  ;;  %s699_s16 = scalar_lea.sflag [#allocation4], %s698_s24 }
 0x1a9   : > { %p886_p3 = pnand %p1486_p5, %p1485_p4 }
 0x1ab   : > { %1111 = dma.done.wait (!%p886_p3), %s699_s16, 128  }
 0x1ac   : > { %1113 = vsyncadd (!%p886_p3), %s699_s16, 4294967168  ;;  %p22_p7 = scmp.ge.s32.totalorder %s1278_s14, 4   ;;  %s1487_s18 = smov %s1120_s19 }
 0x1ad   : > { %s1488_s19 = smov %s1124_s20  ;;  %s1489_s20 = smov %s1294_s27 }
 0x1ae   : > { %s1490_s21 = smov %s1278_s14  ;;  %24 = sbr.rel (!%p22_p7) target bundleno = 11 (0xb), region = 106 }
 0x1b5   :  { %704 = vsyncpa [#allocation3], 1 }
 0x1b6   :  { %706 = vsyncpa [#allocation3 + $0x1], 1 }
 0x1b7   :  { %707 = vsyncpa [#allocation6], 1 }
 0x1b8   :  { %709 = vsyncpa [#allocation6 + $0x1], 1 }
 0x1b9   :  { %710 = vsyncpa [#allocation9], 1 }
 0x1ba   :  { %711 = vsyncpa [#allocation4], 1 }
 0x1bb   :  { %713 = vsyncpa [#allocation4 + $0x1], 1 }

</bundles_post_ra>
